<compile_context>
chip_gen: v6e
topology: v6e:2x2x1
jax: 0.10.0
libtpu: 0.0.40
codegen_flags: <defaults>
</compile_context>

<pallas_src>
import jax
import jax.numpy as jnp
from jax.experimental import pallas as pl
from jax.experimental.pallas import tpu as pltpu


# ----- "config" (synthetic, deterministic) -----------------------------------
class config:
    vocab_size = 32
    hidden_size = 32
    categories_size = 8
    output_size = 32
    dropout = 0.1  # TODO(synk): dropout applied in eval mode (identity); no RNG mask.


C = config.categories_size
V = config.vocab_size
H = config.hidden_size
O = config.output_size


# ----- Pallas kernel ----------------------------------------------------------
def rnn_chunk_kernel(cat_ref,        # (B, C)        fixed conditioning
                     x_ref,          # (TC, B, V)    inputs for this time chunk
                     h0_ref,         # (B, H)        initial hidden state
                     w_cat_ref,      # (C, H+O)      fused [wi2h|wi2o], category rows
                     w_x_ref,        # (V, H+O)      fused weight, input rows
                     w_hh_ref,       # (H, H)        hidden rows -> hidden' (serial path)
                     w_ho_ref,       # (H, O)        hidden rows -> i2o output (epilogue)
                     b_comb_ref,     # (1, H+O)      fused [bi2h | bi2o]
                     w_o2o_h_ref,    # (H, O)        o2o rows for hidden'
                     w_o2o_o_ref,    # (O, O)        o2o rows for i2o output
                     b_o2o_ref,      # (1, O)
                     out_ref,        # (TC, B, O+H)  packed [log_probs | hidden']
                     h_carry,        # VMEM scratch (B, H): hidden across grid steps
                     cat_pre):       # VMEM scratch (B, H+O): category@W_cat + b (const)
    i = pl.program_id(0)
    TC, B, _ = x_ref.shape

    @pl.when(i == 0)
    def _():
        h_carry[...] = h0_ref[...]
        cat_pre[...] = (jnp.dot(cat_ref[...], w_cat_ref[...],
                                preferred_element_type=jnp.float32)
                        + b_comb_ref[...])

    # ---- non-recurrent work for the whole chunk: one big MXU dot ------------
    # base[t] == cat_pre + x[t] @ [w_x]  (first H cols feed hidden', last O feed i2o)
    x_flat = x_ref[...].reshape(TC * B, V)
    base = (jnp.dot(x_flat, w_x_ref[...], preferred_element_type=jnp.float32)
            .reshape(TC, B, H + O) + cat_pre[...][None])
    base_h = base[:, :, :H]
    base_o = base[:, :, H:]

    # ---- serial recurrence: critical path = one (B,H)x(H,H) dot per step ----
    w_hh = w_hh_ref[...]
    h = h_carry[...]
    h_prev_steps = []
    h_new_steps = []
    for t in range(TC):  # static unroll over the chunk
        h_prev_steps.append(h)
        h = base_h[t] + jnp.dot(h, w_hh, preferred_element_type=jnp.float32)
        h_new_steps.append(h)
    h_carry[...] = h

    h_prev = jnp.stack(h_prev_steps, axis=0).reshape(TC * B, H)   # h at step start
    h_new = jnp.stack(h_new_steps, axis=0)                        # (TC, B, H)

    # ---- off-critical-path epilogue, batched over the whole chunk -----------
    # i2o output:  o_pre[t] = cat_pre[:,H:] + x[t]@w_x[:,H:] + h_prev[t]@w_h[:,H:]
    o_pre = (base_o.reshape(TC * B, O)
             + jnp.dot(h_prev, w_ho_ref[...], preferred_element_type=jnp.float32))
    # o2o(cat(hidden', output)) without any concat:
    out2 = (jnp.dot(h_new.reshape(TC * B, H), w_o2o_h_ref[...],
                    preferred_element_type=jnp.float32)
            + jnp.dot(o_pre, w_o2o_o_ref[...], preferred_element_type=jnp.float32)
            + b_o2o_ref[...])

    # dropout: identity (eval mode)

    # batched log_softmax over all TC*B rows at once (EUP/XLU work off the chain)
    m = jnp.max(out2, axis=1, keepdims=True)
    shifted = out2 - m
    lse = jnp.log(jnp.sum(jnp.exp(shifted), axis=1, keepdims=True))
    log_probs = (shifted - lse).reshape(TC, B, O)

    # single packed lane-dense writeback per chunk: [log_probs | hidden']
    out_ref[...] = jnp.concatenate([log_probs, h_new], axis=-1).astype(out_ref.dtype)


# ----- wrappers ---------------------------------------------------------------
def rnn_forward_seq(category, x_seq, hidden0, params, time_chunk=16):
    """Run the RNN cell over a whole sequence in a single pallas_call.

    category: (B, C), x_seq: (T, B, V), hidden0: (B, H)
    Returns (log_probs (T, B, O), hiddens (T, B, H)); hiddens[-1] is the final state.
    """
    T, B, _ = x_seq.shape

    # Pad batch up to a full sublane (multiple of 8); padded rows are discarded.
    B_pad = max(8, -(-B // 8) * 8)
    pad_b = B_pad - B
    if pad_b:
        category = jnp.pad(category, ((0, pad_b), (0, 0)))
        x_seq = jnp.pad(x_seq, ((0, 0), (0, pad_b), (0, 0)))
        hidden0 = jnp.pad(hidden0, ((0, pad_b), (0, 0)))

    # Time chunk: amortize per-grid-step overhead; pad T to a multiple of it.
    TC = int(max(1, min(time_chunk, T)))
    T_pad = -(-T // TC) * TC
    if T_pad != T:
        x_seq = jnp.pad(x_seq, ((0, T_pad - T), (0, 0), (0, 0)))

    const = lambda i: (0, 0)  # same block every step -> DMA'd from HBM exactly once

    packed = pl.pallas_call(
        rnn_chunk_kernel,
        out_shape=jax.ShapeDtypeStruct((T_pad, B_pad, O + H), jnp.float32),
        grid_spec=pltpu.PrefetchScalarGridSpec(
            num_scalar_prefetch=0,
            grid=(T_pad // TC,),
            in_specs=[
                pl.BlockSpec((B_pad, C), const),                      # category
                pl.BlockSpec((TC, B_pad, V), lambda i: (i, 0, 0)),    # x chunk
                pl.BlockSpec((B_pad, H), const),                      # hidden0
                pl.BlockSpec((C, H + O), const),                      # w_cat
                pl.BlockSpec((V, H + O), const),                      # w_x
                pl.BlockSpec((H, H), const),                          # w_hh
                pl.BlockSpec((H, O), const),                          # w_ho
                pl.BlockSpec((1, H + O), const),                      # b_comb
                pl.BlockSpec((H, O), const),                          # w_o2o_h
                pl.BlockSpec((O, O), const),                          # w_o2o_o
                pl.BlockSpec((1, O), const),                          # b_o2o
            ],
            out_specs=pl.BlockSpec((TC, B_pad, O + H), lambda i: (i, 0, 0)),
            scratch_shapes=[
                pltpu.VMEM((B_pad, H), jnp.float32),       # hidden carry
                pltpu.VMEM((B_pad, H + O), jnp.float32),   # cached category term
            ],
        ),
        compiler_params=pltpu.CompilerParams(
            dimension_semantics=("arbitrary",),  # time axis is sequential (hidden carry)
        ),
    )(category, x_seq, hidden0,
      params["w_cat"], params["w_x"], params["w_hh"], params["w_ho"],
      params["b_comb"], params["w_o2o_h"], params["w_o2o_o"], params["b_o2o"])

    log_probs = packed[:T, :B, :O]
    hiddens = packed[:T, :B, O:]
    return log_probs, hiddens


def rnn_forward(category, inp, hidden, params):
    """Single-step forward matching the PyTorch module's call signature."""
    log_probs, hiddens = rnn_forward_seq(category, inp[None], hidden, params,
                                         time_chunk=1)
    return log_probs[0], hiddens[0]


# ----- deterministic parameter init (PyTorch Linear-style uniform) -----------
def init_params(key, weight_dtype=jnp.float32):
    # weight_dtype=jnp.bfloat16 would halve weight DMA/VMEM and cut MXU passes on
    # v6e/v7x (activations/accumulation stay f32); kept f32 so the 1e-4 reference
    # check stays tight.
    Din = C + V + H
    Din2 = H + O
    ks = jax.random.split(key, 3)

    def lin(k, fan_in, fan_out):
        bound = 1.0 / jnp.sqrt(fan_in)
        kw, kb = jax.random.split(k)
        w = jax.random.uniform(kw, (fan_in, fan_out), jnp.float32, -bound, bound)  # (in, out)
        b = jax.random.uniform(kb, (1, fan_out), jnp.float32, -bound, bound)
        return w, b

    wi2o, bi2o = lin(ks[0], Din, O)
    wi2h, bi2h = lin(ks[1], Din, H)
    wo2o, bo2o = lin(ks[2], Din2, O)

    # Fused i2h|i2o weight: combined @ w_comb + b_comb == cat(hidden', output)
    w_comb = jnp.concatenate([wi2h, wi2o], axis=1)   # (Din, H+O)
    b_comb = jnp.concatenate([bi2h, bi2o], axis=1)   # (1, H+O)
    w_h_rows = w_comb[C + V:]                        # hidden rows, (H, H+O)

    params = {
        # row split follows torch.cat order: (category, input, hidden)
        "w_cat": w_comb[:C].astype(weight_dtype),
        "w_x": w_comb[C:C + V].astype(weight_dtype),
        "w_hh": w_h_rows[:, :H].astype(weight_dtype),   # serial-path columns only
        "w_ho": w_h_rows[:, H:].astype(weight_dtype),   # i2o columns (epilogue)
        "b_comb": b_comb,
        # o2o input order is cat(hidden', output): rows [:H] hidden, [H:] output
        "w_o2o_h": wo2o[:H].astype(weight_dtype),
        "w_o2o_o": wo2o[H:].astype(weight_dtype),
        "b_o2o": bo2o,
    }
    raw = {"wi2h": wi2h, "bi2h": bi2h, "wi2o": wi2o, "bi2o": bi2o,
           "wo2o": wo2o, "bo2o": bo2o}
    return params, raw


if __name__ == "__main__":
    key = jax.random.PRNGKey(0)
    kp, kc, kx = jax.random.split(key, 3)

    B, T = 2, 8
    params, raw = init_params(kp)
    category = jax.random.normal(kc, (B, C), jnp.float32)
    x_seq = jax.random.normal(kx, (T, B, V), jnp.float32)
    hidden0 = jnp.zeros((B, H), jnp.float32)   # Rnn.init_hidden()

    # Pure-JAX reference: the original (unfused) per-step cell.
    def ref_step(h, x):
        combined = jnp.concatenate([category, x, h], axis=1)
        h_new = combined @ raw["wi2h"] + raw["bi2h"]
        out = combined @ raw["wi2o"] + raw["bi2o"]
        out2 = jnp.concatenate([h_new, out], axis=1) @ raw["wo2o"] + raw["bo2o"]
        return h_new, (jax.nn.log_softmax(out2, axis=1), h_new)

    _, (ref_lp, ref_h) = jax.lax.scan(ref_step, hidden0, x_seq)

    # Whole sequence in a single chunk (TC = T, one grid step).
    lp_a, h_a = rnn_forward_seq(category, x_seq, hidden0, params, time_chunk=16)
    jax.block_until_ready((lp_a, h_a))
    assert jnp.allclose(lp_a, ref_lp, atol=1e-4), "log_probs mismatch (single chunk)"
    assert jnp.allclose(h_a, ref_h, atol=1e-4), "hidden mismatch (single chunk)"

    # Multiple chunks: exercises hidden carry across grid steps and time padding
    # (T=8, TC=3 -> T_pad=9, grid=(3,)).
    lp_b, h_b = rnn_forward_seq(category, x_seq, hidden0, params, time_chunk=3)
    jax.block_until_ready((lp_b, h_b))
    assert jnp.allclose(lp_b, ref_lp, atol=1e-4), "log_probs mismatch (chunked)"
    assert jnp.allclose(h_b, ref_h, atol=1e-4), "hidden mismatch (chunked)"

    # Single-step path (module-identical signature) also works.
    lp1, h1 = rnn_forward(category, x_seq[0], hidden0, params)
    jax.block_until_ready((lp1, h1))
    assert jnp.allclose(lp1, ref_lp[0], atol=1e-4)
    assert jnp.allclose(h1, ref_h[0], atol=1e-4)

    print("KERNEL_OK")
</pallas_src>

<mosaic_0001>
module attributes {stable_mosaic.version = 11 : i64} {
  func.func @rnn_chunk_kernel(%arg0: i32, %arg1: memref<8x8xf32, #tpu.memory_space<vmem>>, %arg2: memref<8x8x32xf32, #tpu.memory_space<vmem>>, %arg3: memref<8x32xf32, #tpu.memory_space<vmem>>, %arg4: memref<8x64xf32, #tpu.memory_space<vmem>>, %arg5: memref<32x64xf32, #tpu.memory_space<vmem>>, %arg6: memref<32x32xf32, #tpu.memory_space<vmem>>, %arg7: memref<32x32xf32, #tpu.memory_space<vmem>>, %arg8: memref<1x64xf32, #tpu.memory_space<vmem>>, %arg9: memref<32x32xf32, #tpu.memory_space<vmem>>, %arg10: memref<32x32xf32, #tpu.memory_space<vmem>>, %arg11: memref<1x32xf32, #tpu.memory_space<vmem>>, %arg12: memref<8x8x64xf32, #tpu.memory_space<vmem>>, %arg13: memref<8x32xf32, #tpu.memory_space<vmem>>, %arg14: memref<8x64xf32, #tpu.memory_space<vmem>>) attributes {dimension_semantics = [#tpu.dimension_semantics<arbitrary>], iteration_bounds = array<i64: 1>, scalar_prefetch = 0 : i64, scratch_operands = 2 : i64, tpu.core_type = #tpu.core_type<tc>, window_params = [{pipeline_mode = #tpu.pipeline_mode<synchronous>, transform_indices = @transform_0, window_bounds = array<i64: 8, 8>}, {transform_indices = @transform_1, window_bounds = array<i64: 8, 8, 32>}, {pipeline_mode = #tpu.pipeline_mode<synchronous>, transform_indices = @transform_2, window_bounds = array<i64: 8, 32>}, {pipeline_mode = #tpu.pipeline_mode<synchronous>, transform_indices = @transform_3, window_bounds = array<i64: 8, 64>}, {pipeline_mode = #tpu.pipeline_mode<synchronous>, transform_indices = @transform_4, window_bounds = array<i64: 32, 64>}, {pipeline_mode = #tpu.pipeline_mode<synchronous>, transform_indices = @transform_5, window_bounds = array<i64: 32, 32>}, {pipeline_mode = #tpu.pipeline_mode<synchronous>, transform_indices = @transform_6, window_bounds = array<i64: 32, 32>}, {pipeline_mode = #tpu.pipeline_mode<synchronous>, transform_indices = @transform_7, window_bounds = array<i64: 1, 64>}, {pipeline_mode = #tpu.pipeline_mode<synchronous>, transform_indices = @transform_8, window_bounds = array<i64: 32, 32>}, {pipeline_mode = #tpu.pipeline_mode<synchronous>, transform_indices = @transform_9, window_bounds = array<i64: 32, 32>}, {pipeline_mode = #tpu.pipeline_mode<synchronous>, transform_indices = @transform_10, window_bounds = array<i64: 1, 32>}, {transform_indices = @transform_11, window_bounds = array<i64: 8, 8, 64>}]} {
    %c0_i32 = arith.constant 0 : i32
    %0 = arith.cmpi eq, %arg0, %c0_i32 : i32
    %1 = arith.extui %0 : i1 to i32
    %c0_i32_0 = arith.constant 0 : i32
    %2 = arith.cmpi ne, %1, %c0_i32_0 : i32
    scf.if %2 {
      %c0_37 = arith.constant 0 : index
      %c0_38 = arith.constant 0 : index
      %94 = vector.load %arg3[%c0_37, %c0_38] : memref<8x32xf32, #tpu.memory_space<vmem>>, vector<8x32xf32>
      %c0_39 = arith.constant 0 : index
      %c0_40 = arith.constant 0 : index
      %95 = vector.load %arg13[%c0_39, %c0_40] : memref<8x32xf32, #tpu.memory_space<vmem>>, vector<8x32xf32>
      tpu.vector_store %arg13[%c0_39, %c0_40], %94 {strides = array<i32>} : memref<8x32xf32, #tpu.memory_space<vmem>>, vector<8x32xf32>,
      %c0_41 = arith.constant 0 : index
      %c0_42 = arith.constant 0 : index
      %96 = vector.load %arg1[%c0_41, %c0_42] : memref<8x8xf32, #tpu.memory_space<vmem>>, vector<8x8xf32>
      %c0_43 = arith.constant 0 : index
      %c0_44 = arith.constant 0 : index
      %97 = vector.load %arg4[%c0_43, %c0_44] : memref<8x64xf32, #tpu.memory_space<vmem>>, vector<8x64xf32>
      %cst_45 = arith.constant dense<0.000000e+00> : vector<8x64xf32>
      %98 = tpu.matmul %96, %97, %cst_45 {dimension_numbers = #tpu.dot_dimension_numbers<[1], [0], [0], [1], [0, 0, 1, 1], [], []>} : vector<8x8xf32>, vector<8x64xf32>, vector<8x64xf32> -> vector<8x64xf32>
      %c0_46 = arith.constant 0 : index
      %c0_47 = arith.constant 0 : index
      %99 = vector.load %arg8[%c0_46, %c0_47] : memref<1x64xf32, #tpu.memory_space<vmem>>, vector<1x64xf32>
      %100 = vector.broadcast %99 : vector<1x64xf32> to vector<8x64xf32>
      %101 = arith.addf %98, %100 : vector<8x64xf32>
      %c0_48 = arith.constant 0 : index
      %c0_49 = arith.constant 0 : index
      %102 = vector.load %arg14[%c0_48, %c0_49] : memref<8x64xf32, #tpu.memory_space<vmem>>, vector<8x64xf32>
      tpu.vector_store %arg14[%c0_48, %c0_49], %101 {strides = array<i32>} : memref<8x64xf32, #tpu.memory_space<vmem>>, vector<8x64xf32>,
    } else {
    }
    %c0 = arith.constant 0 : index
    %c0_1 = arith.constant 0 : index
    %c0_2 = arith.constant 0 : index
    %3 = vector.load %arg2[%c0, %c0_1, %c0_2] : memref<8x8x32xf32, #tpu.memory_space<vmem>>, vector<8x8x32xf32>
    %4 = vector.shape_cast %3 : vector<8x8x32xf32> to vector<64x32xf32>
    %c0_3 = arith.constant 0 : index
    %c0_4 = arith.constant 0 : index
    %5 = vector.load %arg5[%c0_3, %c0_4] : memref<32x64xf32, #tpu.memory_space<vmem>>, vector<32x64xf32>
    %cst = arith.constant dense<0.000000e+00> : vector<64x64xf32>
    %6 = tpu.matmul %4, %5, %cst {dimension_numbers = #tpu.dot_dimension_numbers<[1], [0], [0], [1], [0, 0, 1, 1], [], []>} : vector<64x32xf32>, vector<32x64xf32>, vector<64x64xf32> -> vector<64x64xf32>
    %7 = vector.shape_cast %6 : vector<64x64xf32> to vector<8x8x64xf32>
    %c0_5 = arith.constant 0 : index
    %c0_6 = arith.constant 0 : index
    %8 = vector.load %arg14[%c0_5, %c0_6] : memref<8x64xf32, #tpu.memory_space<vmem>>, vector<8x64xf32>
    %9 = vector.shape_cast %8 : vector<8x64xf32> to vector<1x8x64xf32>
    %10 = vector.broadcast %9 : vector<1x8x64xf32> to vector<8x8x64xf32>
    %11 = arith.addf %7, %10 : vector<8x8x64xf32>
    %12 = vector.extract_strided_slice %11 {offsets = [0, 0, 0], sizes = [8, 8, 32], strides = [1, 1, 1]} : vector<8x8x64xf32> to vector<8x8x32xf32>
    %13 = vector.extract_strided_slice %11 {offsets = [0, 0, 32], sizes = [8, 8, 32], strides = [1, 1, 1]} : vector<8x8x64xf32> to vector<8x8x32xf32>
    %c0_7 = arith.constant 0 : index
    %c0_8 = arith.constant 0 : index
    %14 = vector.load %arg6[%c0_7, %c0_8] : memref<32x32xf32, #tpu.memory_space<vmem>>, vector<32x32xf32>
    %c0_9 = arith.constant 0 : index
    %c0_10 = arith.constant 0 : index
    %15 = vector.load %arg13[%c0_9, %c0_10] : memref<8x32xf32, #tpu.memory_space<vmem>>, vector<8x32xf32>
    %16 = vector.extract_strided_slice %12 {offsets = [0, 0, 0], sizes = [1, 8, 32], strides = [1, 1, 1]} : vector<8x8x32xf32> to vector<1x8x32xf32>
    %17 = vector.shape_cast %16 : vector<1x8x32xf32> to vector<8x32xf32>
    %cst_11 = arith.constant dense<0.000000e+00> : vector<8x32xf32>
    %18 = tpu.matmul %15, %14, %cst_11 {dimension_numbers = #tpu.dot_dimension_numbers<[1], [0], [0], [1], [0, 0, 1, 1], [], []>} : vector<8x32xf32>, vector<32x32xf32>, vector<8x32xf32> -> vector<8x32xf32>
    %19 = arith.addf %17, %18 : vector<8x32xf32>
    %20 = vector.extract_strided_slice %12 {offsets = [1, 0, 0], sizes = [1, 8, 32], strides = [1, 1, 1]} : vector<8x8x32xf32> to vector<1x8x32xf32>
    %21 = vector.shape_cast %20 : vector<1x8x32xf32> to vector<8x32xf32>
    %cst_12 = arith.constant dense<0.000000e+00> : vector<8x32xf32>
    %22 = tpu.matmul %19, %14, %cst_12 {dimension_numbers = #tpu.dot_dimension_numbers<[1], [0], [0], [1], [0, 0, 1, 1], [], []>} : vector<8x32xf32>, vector<32x32xf32>, vector<8x32xf32> -> vector<8x32xf32>
    %23 = arith.addf %21, %22 : vector<8x32xf32>
    %24 = vector.extract_strided_slice %12 {offsets = [2, 0, 0], sizes = [1, 8, 32], strides = [1, 1, 1]} : vector<8x8x32xf32> to vector<1x8x32xf32>
    %25 = vector.shape_cast %24 : vector<1x8x32xf32> to vector<8x32xf32>
    %cst_13 = arith.constant dense<0.000000e+00> : vector<8x32xf32>
    %26 = tpu.matmul %23, %14, %cst_13 {dimension_numbers = #tpu.dot_dimension_numbers<[1], [0], [0], [1], [0, 0, 1, 1], [], []>} : vector<8x32xf32>, vector<32x32xf32>, vector<8x32xf32> -> vector<8x32xf32>
    %27 = arith.addf %25, %26 : vector<8x32xf32>
    %28 = vector.extract_strided_slice %12 {offsets = [3, 0, 0], sizes = [1, 8, 32], strides = [1, 1, 1]} : vector<8x8x32xf32> to vector<1x8x32xf32>
    %29 = vector.shape_cast %28 : vector<1x8x32xf32> to vector<8x32xf32>
    %cst_14 = arith.constant dense<0.000000e+00> : vector<8x32xf32>
    %30 = tpu.matmul %27, %14, %cst_14 {dimension_numbers = #tpu.dot_dimension_numbers<[1], [0], [0], [1], [0, 0, 1, 1], [], []>} : vector<8x32xf32>, vector<32x32xf32>, vector<8x32xf32> -> vector<8x32xf32>
    %31 = arith.addf %29, %30 : vector<8x32xf32>
    %32 = vector.extract_strided_slice %12 {offsets = [4, 0, 0], sizes = [1, 8, 32], strides = [1, 1, 1]} : vector<8x8x32xf32> to vector<1x8x32xf32>
    %33 = vector.shape_cast %32 : vector<1x8x32xf32> to vector<8x32xf32>
    %cst_15 = arith.constant dense<0.000000e+00> : vector<8x32xf32>
    %34 = tpu.matmul %31, %14, %cst_15 {dimension_numbers = #tpu.dot_dimension_numbers<[1], [0], [0], [1], [0, 0, 1, 1], [], []>} : vector<8x32xf32>, vector<32x32xf32>, vector<8x32xf32> -> vector<8x32xf32>
    %35 = arith.addf %33, %34 : vector<8x32xf32>
    %36 = vector.extract_strided_slice %12 {offsets = [5, 0, 0], sizes = [1, 8, 32], strides = [1, 1, 1]} : vector<8x8x32xf32> to vector<1x8x32xf32>
    %37 = vector.shape_cast %36 : vector<1x8x32xf32> to vector<8x32xf32>
    %cst_16 = arith.constant dense<0.000000e+00> : vector<8x32xf32>
    %38 = tpu.matmul %35, %14, %cst_16 {dimension_numbers = #tpu.dot_dimension_numbers<[1], [0], [0], [1], [0, 0, 1, 1], [], []>} : vector<8x32xf32>, vector<32x32xf32>, vector<8x32xf32> -> vector<8x32xf32>
    %39 = arith.addf %37, %38 : vector<8x32xf32>
    %40 = vector.extract_strided_slice %12 {offsets = [6, 0, 0], sizes = [1, 8, 32], strides = [1, 1, 1]} : vector<8x8x32xf32> to vector<1x8x32xf32>
    %41 = vector.shape_cast %40 : vector<1x8x32xf32> to vector<8x32xf32>
    %cst_17 = arith.constant dense<0.000000e+00> : vector<8x32xf32>
    %42 = tpu.matmul %39, %14, %cst_17 {dimension_numbers = #tpu.dot_dimension_numbers<[1], [0], [0], [1], [0, 0, 1, 1], [], []>} : vector<8x32xf32>, vector<32x32xf32>, vector<8x32xf32> -> vector<8x32xf32>
    %43 = arith.addf %41, %42 : vector<8x32xf32>
    %44 = vector.extract_strided_slice %12 {offsets = [7, 0, 0], sizes = [1, 8, 32], strides = [1, 1, 1]} : vector<8x8x32xf32> to vector<1x8x32xf32>
    %45 = vector.shape_cast %44 : vector<1x8x32xf32> to vector<8x32xf32>
    %cst_18 = arith.constant dense<0.000000e+00> : vector<8x32xf32>
    %46 = tpu.matmul %43, %14, %cst_18 {dimension_numbers = #tpu.dot_dimension_numbers<[1], [0], [0], [1], [0, 0, 1, 1], [], []>} : vector<8x32xf32>, vector<32x32xf32>, vector<8x32xf32> -> vector<8x32xf32>
    %47 = arith.addf %45, %46 : vector<8x32xf32>
    %c0_19 = arith.constant 0 : index
    %c0_20 = arith.constant 0 : index
    %48 = vector.load %arg13[%c0_19, %c0_20] : memref<8x32xf32, #tpu.memory_space<vmem>>, vector<8x32xf32>
    tpu.vector_store %arg13[%c0_19, %c0_20], %47 {strides = array<i32>} : memref<8x32xf32, #tpu.memory_space<vmem>>, vector<8x32xf32>,
    %49 = vector.shape_cast %15 : vector<8x32xf32> to vector<1x8x32xf32>
    %50 = vector.shape_cast %19 : vector<8x32xf32> to vector<1x8x32xf32>
    %51 = vector.shape_cast %23 : vector<8x32xf32> to vector<1x8x32xf32>
    %52 = vector.shape_cast %27 : vector<8x32xf32> to vector<1x8x32xf32>
    %53 = vector.shape_cast %31 : vector<8x32xf32> to vector<1x8x32xf32>
    %54 = vector.shape_cast %35 : vector<8x32xf32> to vector<1x8x32xf32>
    %55 = vector.shape_cast %39 : vector<8x32xf32> to vector<1x8x32xf32>
    %56 = vector.shape_cast %43 : vector<8x32xf32> to vector<1x8x32xf32>
    %57 = tpu.concatenate %49, %50, %51, %52, %53, %54, %55, %56 in 0 : vector<1x8x32xf32>, vector<1x8x32xf32>, vector<1x8x32xf32>, vector<1x8x32xf32>, vector<1x8x32xf32>, vector<1x8x32xf32>, vector<1x8x32xf32>, vector<1x8x32xf32> -> vector<8x8x32xf32>
    %58 = vector.shape_cast %57 : vector<8x8x32xf32> to vector<64x32xf32>
    %59 = vector.shape_cast %19 : vector<8x32xf32> to vector<1x8x32xf32>
    %60 = vector.shape_cast %23 : vector<8x32xf32> to vector<1x8x32xf32>
    %61 = vector.shape_cast %27 : vector<8x32xf32> to vector<1x8x32xf32>
    %62 = vector.shape_cast %31 : vector<8x32xf32> to vector<1x8x32xf32>
    %63 = vector.shape_cast %35 : vector<8x32xf32> to vector<1x8x32xf32>
    %64 = vector.shape_cast %39 : vector<8x32xf32> to vector<1x8x32xf32>
    %65 = vector.shape_cast %43 : vector<8x32xf32> to vector<1x8x32xf32>
    %66 = vector.shape_cast %47 : vector<8x32xf32> to vector<1x8x32xf32>
    %67 = tpu.concatenate %59, %60, %61, %62, %63, %64, %65, %66 in 0 : vector<1x8x32xf32>, vector<1x8x32xf32>, vector<1x8x32xf32>, vector<1x8x32xf32>, vector<1x8x32xf32>, vector<1x8x32xf32>, vector<1x8x32xf32>, vector<1x8x32xf32> -> vector<8x8x32xf32>
    %68 = vector.shape_cast %13 : vector<8x8x32xf32> to vector<64x32xf32>
    %c0_21 = arith.constant 0 : index
    %c0_22 = arith.constant 0 : index
    %69 = vector.load %arg7[%c0_21, %c0_22] : memref<32x32xf32, #tpu.memory_space<vmem>>, vector<32x32xf32>
    %cst_23 = arith.constant dense<0.000000e+00> : vector<64x32xf32>
    %70 = tpu.matmul %58, %69, %cst_23 {dimension_numbers = #tpu.dot_dimension_numbers<[1], [0], [0], [1], [0, 0, 1, 1], [], []>} : vector<64x32xf32>, vector<32x32xf32>, vector<64x32xf32> -> vector<64x32xf32>
    %71 = arith.addf %68, %70 : vector<64x32xf32>
    %72 = vector.shape_cast %67 : vector<8x8x32xf32> to vector<64x32xf32>
    %c0_24 = arith.constant 0 : index
    %c0_25 = arith.constant 0 : index
    %73 = vector.load %arg9[%c0_24, %c0_25] : memref<32x32xf32, #tpu.memory_space<vmem>>, vector<32x32xf32>
    %cst_26 = arith.constant dense<0.000000e+00> : vector<64x32xf32>
    %74 = tpu.matmul %72, %73, %cst_26 {dimension_numbers = #tpu.dot_dimension_numbers<[1], [0], [0], [1], [0, 0, 1, 1], [], []>} : vector<64x32xf32>, vector<32x32xf32>, vector<64x32xf32> -> vector<64x32xf32>
    %c0_27 = arith.constant 0 : index
    %c0_28 = arith.constant 0 : index
    %75 = vector.load %arg10[%c0_27, %c0_28] : memref<32x32xf32, #tpu.memory_space<vmem>>, vector<32x32xf32>
    %cst_29 = arith.constant dense<0.000000e+00> : vector<64x32xf32>
    %76 = tpu.matmul %71, %75, %cst_29 {dimension_numbers = #tpu.dot_dimension_numbers<[1], [0], [0], [1], [0, 0, 1, 1], [], []>} : vector<64x32xf32>, vector<32x32xf32>, vector<64x32xf32> -> vector<64x32xf32>
    %77 = arith.addf %74, %76 : vector<64x32xf32>
    %c0_30 = arith.constant 0 : index
    %c0_31 = arith.constant 0 : index
    %78 = vector.load %arg11[%c0_30, %c0_31] : memref<1x32xf32, #tpu.memory_space<vmem>>, vector<1x32xf32>
    %79 = vector.broadcast %78 : vector<1x32xf32> to vector<64x32xf32>
    %80 = arith.addf %77, %79 : vector<64x32xf32>
    %cst_32 = arith.constant dense<0xFF800000> : vector<64xf32>
    %81 = vector.multi_reduction <maximumf>, %80, %cst_32 [1] : vector<64x32xf32> to vector<64xf32>
    %82 = vector.shape_cast %81 : vector<64xf32> to vector<64x1xf32>
    %83 = vector.broadcast %82 : vector<64x1xf32> to vector<64x32xf32>
    %84 = arith.subf %80, %83 : vector<64x32xf32>
    %85 = math.exp %84 : vector<64x32xf32>
    %cst_33 = arith.constant dense<0.000000e+00> : vector<64xf32>
    %86 = vector.multi_reduction <add>, %85, %cst_33 [1] : vector<64x32xf32> to vector<64xf32>
    %87 = vector.shape_cast %86 : vector<64xf32> to vector<64x1xf32>
    %88 = math.log %87 : vector<64x1xf32>
    %89 = vector.broadcast %88 : vector<64x1xf32> to vector<64x32xf32>
    %90 = arith.subf %84, %89 : vector<64x32xf32>
    %91 = vector.shape_cast %90 : vector<64x32xf32> to vector<8x8x32xf32>
    %92 = tpu.concatenate %91, %67 in 2 : vector<8x8x32xf32>, vector<8x8x32xf32> -> vector<8x8x64xf32>
    %c0_34 = arith.constant 0 : index
    %c0_35 = arith.constant 0 : index
    %c0_36 = arith.constant 0 : index
    %93 = vector.load %arg12[%c0_34, %c0_35, %c0_36] : memref<8x8x64xf32, #tpu.memory_space<vmem>>, vector<8x8x64xf32>
    tpu.vector_store %arg12[%c0_34, %c0_35, %c0_36], %92 {strides = array<i32>} : memref<8x8x64xf32, #tpu.memory_space<vmem>>, vector<8x8x64xf32>,
    return
  }
  func.func @transform_0(%arg0: i32) -> (i32, i32) {
    %c0_i32 = arith.constant 0 : i32
    %c0_i32_0 = arith.constant 0 : i32
    %c0_i32_1 = arith.constant 0 : i32
    return %c0_i32, %c0_i32_0 : i32, i32
  }
  func.func @transform_1(%arg0: i32) -> (i32, i32, i32) {
    %c0_i32 = arith.constant 0 : i32
    %c0_i32_0 = arith.constant 0 : i32
    %c0_i32_1 = arith.constant 0 : i32
    return %arg0, %c0_i32, %c0_i32_0 : i32, i32, i32
  }
  func.func @transform_2(%arg0: i32) -> (i32, i32) {
    %c0_i32 = arith.constant 0 : i32
    %c0_i32_0 = arith.constant 0 : i32
    %c0_i32_1 = arith.constant 0 : i32
    return %c0_i32, %c0_i32_0 : i32, i32
  }
  func.func @transform_3(%arg0: i32) -> (i32, i32) {
    %c0_i32 = arith.constant 0 : i32
    %c0_i32_0 = arith.constant 0 : i32
    %c0_i32_1 = arith.constant 0 : i32
    return %c0_i32, %c0_i32_0 : i32, i32
  }
  func.func @transform_4(%arg0: i32) -> (i32, i32) {
    %c0_i32 = arith.constant 0 : i32
    %c0_i32_0 = arith.constant 0 : i32
    %c0_i32_1 = arith.constant 0 : i32
    return %c0_i32, %c0_i32_0 : i32, i32
  }
  func.func @transform_5(%arg0: i32) -> (i32, i32) {
    %c0_i32 = arith.constant 0 : i32
    %c0_i32_0 = arith.constant 0 : i32
    %c0_i32_1 = arith.constant 0 : i32
    return %c0_i32, %c0_i32_0 : i32, i32
  }
  func.func @transform_6(%arg0: i32) -> (i32, i32) {
    %c0_i32 = arith.constant 0 : i32
    %c0_i32_0 = arith.constant 0 : i32
    %c0_i32_1 = arith.constant 0 : i32
    return %c0_i32, %c0_i32_0 : i32, i32
  }
  func.func @transform_7(%arg0: i32) -> (i32, i32) {
    %c0_i32 = arith.constant 0 : i32
    %c0_i32_0 = arith.constant 0 : i32
    %c0_i32_1 = arith.constant 0 : i32
    return %c0_i32, %c0_i32_0 : i32, i32
  }
  func.func @transform_8(%arg0: i32) -> (i32, i32) {
    %c0_i32 = arith.constant 0 : i32
    %c0_i32_0 = arith.constant 0 : i32
    %c0_i32_1 = arith.constant 0 : i32
    return %c0_i32, %c0_i32_0 : i32, i32
  }
  func.func @transform_9(%arg0: i32) -> (i32, i32) {
    %c0_i32 = arith.constant 0 : i32
    %c0_i32_0 = arith.constant 0 : i32
    %c0_i32_1 = arith.constant 0 : i32
    return %c0_i32, %c0_i32_0 : i32, i32
  }
  func.func @transform_10(%arg0: i32) -> (i32, i32) {
    %c0_i32 = arith.constant 0 : i32
    %c0_i32_0 = arith.constant 0 : i32
    %c0_i32_1 = arith.constant 0 : i32
    return %c0_i32, %c0_i32_0 : i32, i32
  }
  func.func @transform_11(%arg0: i32) -> (i32, i32, i32) {
    %c0_i32 = arith.constant 0 : i32
    %c0_i32_0 = arith.constant 0 : i32
    %c0_i32_1 = arith.constant 0 : i32
    return %arg0, %c0_i32, %c0_i32_0 : i32, i32, i32
  }
}

</mosaic_0001>

<bundles_post_ra>
// kernel: tpu_custom_call.1
= control target key start
LH: loop header
LB: loop body
LE: loop exit
PB: predicated region body
PF: predicated region fallthrough
CT: control target
= control target key end

     0   :  { %16 = vsyncpa [#allocation5], 0  ;;  %s2596_s0 = inlined_call_operand.hbm [shape: f32[8,8], index: 0, kind: input, shape index: {}]   ;;  %s2597_s1 = inlined_call_operand.hbm [shape: f32[8,8,32], index: 1, kind: input, shape index: {}]   ;;  %s2598_s2 = inlined_call_operand.hbm [shape: f32[8,32], index: 2, kind: input, shape index: {}]   ;;  %s2599_s3 = inlined_call_operand.hbm [shape: f32[8,64], index: 3, kind: input, shape index: {}]   ;;  %s2600_s4 = inlined_call_operand.hbm [shape: f32[32,64], index: 4, kind: input, shape index: {}]   ;;  %s2601_s5 = inlined_call_operand.hbm [shape: f32[32,32], index: 5, kind: input, shape index: {}]   ;;  %s2602_s6 = inlined_call_operand.hbm [shape: f32[32,32], index: 6, kind: input, shape index: {}]   ;;  %s2603_s7 = inlined_call_operand.vmem [shape: f32[1,64], index: 7, kind: input, shape index: {}]   ;;  %s2604_s8 = inlined_call_operand.hbm [shape: f32[32,32], index: 8, kind: input, shape index: {}]   ;;  %s2605_s9 = inlined_call_operand.hbm [shape: f32[32,32], index: 9, kind: input, shape index: {}]   ;;  %s2606_s10 = inlined_call_operand.vmem [shape: f32[1,32], index: 10, kind: input, shape index: {}]   ;;  %s2607_s11 = inlined_call_operand.hbm [shape: f32[8,8,64], index: 11, kind: output, shape index: {}]  }
   0x1   :  { %17 = vsyncpa [#allocation8], 0 }
   0x2   :  { %18 = vsyncpa [#allocation11], 0 }
   0x3   :  { %19 = vsyncpa [#allocation14], 0 }
   0x4   :  { %20 = vsyncpa [#allocation17], 0 }
   0x5   :  { %21 = vsyncpa [#allocation6], 0  ;;  %s2153_s17 = smov [#allocation7]  }
   0x6   :  { %s37_s18 = sshll.u32 %s2153_s17, 4  ;;  %s38_s18 = int_to_ptr.vmem [resolvable:$true] %s37_s18 }
   0x7   :  { %s1949_s19 = scalar_lea.vmem %s38_s18, 1024  ;;  %p1954_p1 = scmp.lt.s32.totalorder %s38_s18, %s38_s18 }
   0x8   :  { %p1950_p0 = scmp.ne.s32.totalorder %s38_s18, %s1949_s19  ;;  %p1955_p2 = scmp.lt.s32.totalorder %s1949_s19, %s1949_s19 }
   0xa   :  { %p1956_p3 = por %p1955_p2, %p1954_p1 }
   0xc   :  { %p1957_p4 = pnand %p1956_p3, %p1950_p0 }
   0xe   :  { %1960 = shalt.err (!%p1957_p4)
}
   0xf   :  { %s2154_s20 = smov 128   ;;  %s2155_s21 = smov 8  }
  0x10   :  { %43 = dma.hbm_to_vmem [thread:$0]  %s2597_s1, 1024, %s38_s18, [#allocation8], %s2154_s20, %s2154_s20, %s2155_s21  }
  0x11   :  { %s2156_s24 = smov [#allocation10]   ;;  %s2157_s26 = smov [#allocation13]  }
  0x12   :  { %s60_s25 = sshll.u32 %s2156_s24, 4  ;;  %s81_s27 = sshll.u32 %s2157_s26, 4  ;;  %s61_s25 = int_to_ptr.vmem [resolvable:$true] %s60_s25  ;;  %s82_s27 = int_to_ptr.vmem [resolvable:$true] %s81_s27 }
  0x13   :  { %s1969_s28 = scalar_lea.vmem %s61_s25, 128  ;;  %p1974_p6 = scmp.lt.s32.totalorder %s61_s25, %s61_s25 }
  0x14   :  { %p1970_p5 = scmp.ne.s32.totalorder %s61_s25, %s1969_s28  ;;  %p1975_p7 = scmp.lt.s32.totalorder %s1969_s28, %s1969_s28 }
  0x16   :  { %p1976_p8 = por %p1975_p7, %p1974_p6 }
  0x18   :  { %p1977_p9 = pnand %p1976_p8, %p1970_p5 }
  0x1a   :  { %1980 = shalt.err (!%p1977_p9)
}
  0x1b   :  { %63 = dma.hbm_to_vmem [thread:$0]  %s2599_s3, 128, %s61_s25, [#allocation11]  }
  0x1c   :  { %s1989_s12 = scalar_lea.vmem %s82_s27, 512  ;;  %p1994_p11 = scmp.lt.s32.totalorder %s82_s27, %s82_s27 }
  0x1d   :  { %p1990_p10 = scmp.ne.s32.totalorder %s82_s27, %s1989_s12  ;;  %p1995_p12 = scmp.lt.s32.totalorder %s1989_s12, %s1989_s12 }
  0x1f   :  { %p1996_p13 = por %p1995_p12, %p1994_p11 }
  0x21   :  { %p1997_p0 = pnand %p1996_p13, %p1990_p10 }
  0x23   :  { %2000 = shalt.err (!%p1997_p0)
}
  0x24   :  { %87 = dma.hbm_to_vmem [thread:$0]  %s2601_s5, 512, %s82_s27, [#allocation14], %s2154_s20, %s2154_s20, %s2155_s21  }
  0x25   :  { %s2158_s14 = smov [#allocation16]   ;;  %s2159_s16 = smov [#allocation4]  }
  0x26   :  { %s107_s15 = sshll.u32 %s2158_s14, 4  ;;  %s28_s3 = sshll.u32 %s2159_s16, 4  ;;  %s108_s15 = int_to_ptr.vmem [resolvable:$true] %s107_s15  ;;  %s29_s3 = int_to_ptr.vmem [resolvable:$true] %s28_s3 }
  0x27   :  { %s2009_s17 = scalar_lea.vmem %s108_s15, 512  ;;  %p2014_p2 = scmp.lt.s32.totalorder %s108_s15, %s108_s15 }
  0x28   :  { %p2010_p1 = scmp.ne.s32.totalorder %s108_s15, %s2009_s17  ;;  %p2015_p3 = scmp.lt.s32.totalorder %s2009_s17, %s2009_s17 }
  0x2a   :  { %p2016_p4 = por %p2015_p3, %p2014_p2 }
  0x2c   :  { %p2017_p5 = pnand %p2016_p4, %p2010_p1 }
  0x2e   :  { %2020 = shalt.err (!%p2017_p5)
}
  0x2f   :  { %113 = dma.hbm_to_vmem [thread:$0]  %s2604_s8, 512, %s108_s15, [#allocation17], %s2154_s20, %s2154_s20, %s2155_s21  }
  0x30   :  { %s2029_s5 = scalar_lea.vmem %s29_s3, 128  ;;  %p2034_p7 = scmp.lt.s32.totalorder %s29_s3, %s29_s3 }
  0x31   :  { %p2030_p6 = scmp.ne.s32.totalorder %s29_s3, %s2029_s5  ;;  %p2035_p8 = scmp.lt.s32.totalorder %s2029_s5, %s2029_s5 }
  0x33   :  { %p2036_p9 = por %p2035_p8, %p2034_p7 }
  0x35   :  { %p2037_p10 = pnand %p2036_p9, %p2030_p6 }
  0x37   :  { %2040 = shalt.err (!%p2037_p10)
}
  0x38   :  { %31 = dma.hbm_to_vmem [thread:$0]  %s2596_s0, 128, %s29_s3, [#allocation5]  }
  0x39   :  { %s2160_s24 = smov [#allocation9]   ;;  %s2161_s26 = smov [#allocation12]  }
  0x3a   :  { %s50_s25 = sshll.u32 %s2160_s24, 4  ;;  %s69_s27 = sshll.u32 %s2161_s26, 4  ;;  %s51_s25 = int_to_ptr.vmem [resolvable:$true] %s50_s25  ;;  %s70_s27 = int_to_ptr.vmem [resolvable:$true] %s69_s27 }
  0x3b   :  { %s2049_s28 = scalar_lea.vmem %s51_s25, 128  ;;  %p2054_p12 = scmp.lt.s32.totalorder %s51_s25, %s51_s25 }
  0x3c   :  { %p2050_p11 = scmp.ne.s32.totalorder %s51_s25, %s2049_s28  ;;  %p2055_p13 = scmp.lt.s32.totalorder %s2049_s28, %s2049_s28 }
  0x3e   :  { %p2056_p0 = por %p2055_p13, %p2054_p12 }
  0x40   :  { %p2057_p1 = pnand %p2056_p0, %p2050_p11 }
  0x42   :  { %2060 = shalt.err (!%p2057_p1)
}
  0x43   :  { %53 = dma.hbm_to_vmem [thread:$0]  %s2598_s2, 128, %s51_s25, [#allocation8]  }
  0x44   :  { %s2069_s30 = scalar_lea.vmem %s70_s27, 512  ;;  %p2074_p3 = scmp.lt.s32.totalorder %s70_s27, %s70_s27 }
  0x45   :  { %p2070_p2 = scmp.ne.s32.totalorder %s70_s27, %s2069_s30  ;;  %p2075_p4 = scmp.lt.s32.totalorder %s2069_s30, %s2069_s30 }
  0x47   :  { %p2076_p5 = por %p2075_p4, %p2074_p3 }
  0x49   :  { %p2077_p6 = pnand %p2076_p5, %p2070_p2 }
  0x4b   :  { %2080 = shalt.err (!%p2077_p6)
}
  0x4c   :  { %75 = dma.hbm_to_vmem [thread:$0]  %s2600_s4, 512, %s70_s27, [#allocation11], %s2154_s20, %s2154_s20, %s2155_s21  }
  0x4d   :  { %s2162_s1 = smov [#allocation15]   ;;  %s2163_s14 = smov [#allocation18]  }
  0x4e   :  { %s93_s13 = sshll.u32 %s2162_s1, 4  ;;  %s119_s2 = sshll.u32 %s2163_s14, 4  ;;  %s94_s13 = int_to_ptr.vmem [resolvable:$true] %s93_s13  ;;  %s120_s2 = int_to_ptr.vmem [resolvable:$true] %s119_s2 }
  0x4f   :  { %s2089_s15 = scalar_lea.vmem %s94_s13, 512  ;;  %p2094_p8 = scmp.lt.s32.totalorder %s94_s13, %s94_s13 }
  0x50   :  { %p2090_p7 = scmp.ne.s32.totalorder %s94_s13, %s2089_s15  ;;  %p2095_p9 = scmp.lt.s32.totalorder %s2089_s15, %s2089_s15 }
  0x52   :  { %p2096_p10 = por %p2095_p9, %p2094_p8 }
  0x54   :  { %p2097_p11 = pnand %p2096_p10, %p2090_p7 }
  0x56   :  { %2100 = shalt.err (!%p2097_p11)
}
  0x57   :  { %99 = dma.hbm_to_vmem [thread:$0]  %s2602_s6, 512, %s94_s13, [#allocation14], %s2154_s20, %s2154_s20, %s2155_s21  }
  0x58   :  { %s2109_s4 = scalar_lea.vmem %s120_s2, 512  ;;  %p2114_p13 = scmp.lt.s32.totalorder %s120_s2, %s120_s2 }
  0x59   :  { %p2110_p12 = scmp.ne.s32.totalorder %s120_s2, %s2109_s4  ;;  %p2115_p0 = scmp.lt.s32.totalorder %s2109_s4, %s2109_s4 }
  0x5b   :  { %p2116_p1 = por %p2115_p0, %p2114_p13 }
  0x5d   :  { %p2117_p2 = pnand %p2116_p1, %p2110_p12 }
  0x5f   :  { %2120 = shalt.err (!%p2117_p2)
}
  0x60   :  { %125 = dma.hbm_to_vmem [thread:$0]  %s2605_s9, 512, %s120_s2, [#allocation17], %s2154_s20, %s2154_s20, %s2155_s21  }
  0x61   :  { %2141 = dma.done.wait [#allocation5], 128  }
  0x62   :  { %2142 = vsyncadd [#allocation5], 4294967168 }
  0x63   :  { %2143 = dma.done.wait [#allocation8], 1152  }
  0x64   :  { %2144 = vsyncadd [#allocation8], 4294966144 }
  0x65   :  { %2145 = dma.done.wait [#allocation11], 640  }
  0x66   :  { %2146 = vsyncadd [#allocation11], 4294966656 }
  0x67   :  { %2147 = dma.done.wait [#allocation14], 1024  }
  0x68   :  { %2148 = vsyncadd [#allocation14], 4294966272 }
  0x69   :  { %2149 = dma.done.wait [#allocation17], 1024  }
  0x6a   :  { %2150 = vsyncadd [#allocation17], 4294966272  ;;  %v2164_v0 = vmov 0.0   ;;  %vm2165_vm0 = vmmov 0   ;;  %vm171_vm1 = vcmask 64512   ;;  %v163_v1 = vld [vmem:[#allocation10] sm:$0xff] }
  0x6b   :  { %1712 = vmatprep.subr.mxu0 %v2164_v0  ;;  %1714 = vmatprep.mubr.msk.f32.mxu0 %vm2165_vm0, %v2164_v0  ;;  %v258_v2 = vld [vmem:[#allocation12 + $0x18] sm:$0xff]  ;;  %v162_v3 = vld [vmem:[#allocation4] sm:$0xff]  ;;  %v257_v4 = vld [vmem:[#allocation12 + $0x10] sm:$0xff]  ;;  %vm160_vm2 = vcmask 261120   ;;  %vm245_vm3 = vcmask 523264   ;;  %s2167_s19 = smov 96  }
  0x6c   :  { %1713 = vmatpush3.msra.mxu0 %v163_v1  ;;  %1885 = vmatprep.subr.mxu1 %v258_v2  ;;  %v256_v5 = vld [vmem:[#allocation12 + $0x8] sm:$0xff]  ;;  %v255_v6 = vld [vmem:[#allocation12] sm:$0xff]  ;;  %v251_v7 = vld [vmem:[#allocation7 + $0x20] sm:$0xff] }
  0x6d   :  { %1715 = vmatmul.mubr.msk.f32.vlgmr.msra.gmra.mxu0 %vm171_vm1, %v162_v3  ;;  %1717 = vmatprep.subr.mxu0 %v258_v2  ;;  %v159_v8 = vld [vmem:[#allocation9] sm:$0xff]  ;;  %v252_v10 = vld [vmem:[#allocation7 + $0x28] sm:$0xff]  ;;  %v253_v12 = vld [vmem:[#allocation7 + $0x30] sm:$0xff] }
  0x6e   :  { %1889 = vmatpush3.msra.mxu1 %v258_v2  ;;  %1718 = vmatpush3.msra.mxu0 %v258_v2  ;;  %v247_v9 = vld [vmem:[#allocation7] sm:$0xff]  ;;  %161 = vst.msk [vmem:[#allocation2] sm:$0xff] %vm160_vm2, %v159_v8  ;;  %v248_v11 = vld [vmem:[#allocation7 + $0x8] sm:$0xff]  ;;  %v249_v14 = vld [vmem:[#allocation7 + $0x10] sm:$0xff] }
  0x6f   :  { %1886 = vmatprep.subr.mxu1 %v257_v4  ;;  %1719 = vmatprep.subr.mxu0 %v257_v4  ;;  %v2280_v13 = vld [vmem:[#allocation13 + $0x18] sm:$0xff]  ;;  %v254_v15 = vld [vmem:[#allocation7 + $0x38] sm:$0xff]  ;;  %v2286_v16 = vld [vmem:[#allocation13 + $0x10] sm:$0xff] }
  0x70   :  { %1890 = vmatpush3.msra.mxu1 %v257_v4  ;;  %1720 = vmatpush3.msra.mxu0 %v257_v4  ;;  %v250_v17 = vld [vmem:[#allocation7 + $0x18] sm:$0xff]  ;;  %v2298_v19 = vld [vmem:[#allocation13] sm:$0xff]  ;;  %v1579_v21 = vld [vmem:[%s2603_s7] ss:$0 sm:$0xff]  ;;  %s2166_s7 = smov 32  }
  0x71   :  { %1887 = vmatprep.subr.mxu1 %v256_v5  ;;  %1721 = vmatprep.subr.mxu0 %v256_v5  ;;  %v2291_v18 = vld [vmem:[#allocation13 + $0x8] sm:$0xff]  ;;  %v999_v56 = vld [vmem:[#allocation15 + $0x18] sm:$0xff]  ;;  %v998_v60 = vld [vmem:[#allocation15 + $0x10] sm:$0xff] }
  0x72   :  { %1891 = vmatpush3.msra.mxu1 %v256_v5  ;;  %1722 = vmatpush3.msra.mxu0 %v256_v5  ;;  %v997_v61 = vld [vmem:[#allocation15 + $0x8] sm:$0xff]  ;;  %v996_v62 = vld [vmem:[#allocation15] sm:$0xff]  ;;  %v1148_v63 = vld [vmem:[#allocation16 + $0x18] sm:$0xff] }
  0x73   :  { %1888 = vmatprep.subr.mxu1 %v255_v6  ;;  %1723 = vmatprep.subr.mxu0 %v255_v6  ;;  %v1146_v1 = vld [vmem:[#allocation16 + $0x8] sm:$0xff]  ;;  %v1145_v2 = vld [vmem:[#allocation16] sm:$0xff] }
  0x74   :  { %1892 = vmatpush3.msra.mxu1 %v255_v6  ;;  %1731 = vmatprep.mubr.msk.f32.mxu1 %vm160_vm2, %v251_v7 }
  0x75   :  { %1724 = vmatpush3.msra.mxu0 %v255_v6  ;;  %1725 = vmatprep.mubr.msk.f32.mxu0 %vm160_vm2, %v247_v9  ;;  %v2303_v20 = vld [vmem:[#allocation2] sm:$0xff] }
  0x76   :  { %1732 = vmatmul.mubr.msk.f32.vlgmr.msra.gmra.mxu1 %vm160_vm2, %v252_v10  ;;  %1726 = vmatmul.mubr.msk.f32.vlgmr.msra.gmra.mxu0 %vm160_vm2, %v248_v11 }
  0x77   :  { %1737 = vmatprep.subr.mxu0 %v2164_v0  ;;  %1734 = vmatprep.mubr.msk.f32.mxu1 %vm160_vm2, %v253_v12 }
  0x78   :  { %1738 = vmatpush3.msra.mxu0 %v2280_v13  ;;  %1728 = vmatprep.mubr.msk.f32.mxu0 %vm160_vm2, %v249_v14  ;;  %v1151_v14 = vld [vmem:[#allocation18 + $0x10] sm:$0xff] }
  0x79   :  { %1739 = vmatprep.subr.mxu0 %v2164_v0  ;;  %1759 = vmatprep.subr.mxu1 %v2164_v0 }
  0x7a   :  { %1735 = vmatmul.mubr.msk.f32.gmra.mxu1 %vm160_vm2, %v254_v15  ;;  %1740 = vmatpush3.msra.mxu0 %v2286_v16  ;;  %v1150_v15 = vld [vmem:[#allocation18 + $0x8] sm:$0xff] }
  0x7b   :  { %1729 = vmatmul.mubr.msk.f32.gmra.mxu0 %vm160_vm2, %v250_v17  ;;  %1741 = vmatprep.subr.mxu0 %v2164_v0 }
  0x7c   :  { %1742 = vmatpush3.msra.mxu0 %v2291_v18  ;;  %1745 = vmatprep.mubr.msk.f32.mxu0 %vm2165_vm0, %v2164_v0 }
  0x7d   :  { %1743 = vmatprep.subr.mxu0 %v2164_v0  ;;  %1760 = vmatpush3.msra.mxu1 %v2280_v13 }
  0x7e   :  { %1744 = vmatpush3.msra.mxu0 %v2298_v19  ;;  %1761 = vmatprep.subr.mxu1 %v2164_v0 }
  0x7f   :  { %1746 = vmatmul.mubr.msk.f32.vlgmr.msra.gmra.mxu0 %vm160_vm2, %v2303_v20  ;;  %1748 = vmatprep.subr.mxu0 %v2164_v0 }
  0x80   :  { %1749 = vmatpush3.msra.mxu0 %v2280_v13  ;;  %1756 = vmatprep.mubr.msk.f32.mxu0 %vm2165_vm0, %v2164_v0 }
  0x81   :  { %1750 = vmatprep.subr.mxu0 %v2164_v0  ;;  %1762 = vmatpush3.msra.mxu1 %v2286_v16 }
  0x82   :  { %1751 = vmatpush3.msra.mxu0 %v2286_v16  ;;  %1763 = vmatprep.subr.mxu1 %v2164_v0 }
  0x83   :  { %1752 = vmatprep.subr.mxu0 %v2164_v0  ;;  %1764 = vmatpush3.msra.mxu1 %v2291_v18 }
  0x84   :  { %1753 = vmatpush3.msra.mxu0 %v2291_v18  ;;  %1765 = vmatprep.subr.mxu1 %v2164_v0 }
  0x85   :  { %1754 = vmatprep.subr.mxu0 %v2164_v0  ;;  %1766 = vmatpush3.msra.mxu1 %v2298_v19 }
  0x86   :  { %1755 = vmatpush3.msra.mxu0 %v2298_v19  ;;  %1767 = vmatprep.mubr.msk.f32.mxu1 %vm2165_vm0, %v2164_v0 }
  0x87   :  { %1770 = vmatprep.subr.mxu0 %v2164_v0  ;;  %1781 = vmatprep.subr.mxu1 %v2164_v0 }
 0x12d   :  { %v241_v22 = vpop.f32.mrf.mxu0 }
 0x12e   :  { %v242_v23 = vadd.f32 %v1579_v21, %v241_v22 }
 0x12f   :  { %v1716_v24 = vpop.f32.mrf.mxu0 }
 0x130   :  { %246 = vst.msk [vmem:[#allocation3] sm:$0xff] %vm245_vm3, %v242_v23 }
 0x136   :  { %v1733_v25 = vpop.f32.mrf.mxu1  ;;  %v1727_v26 = vpop.f32.mrf.mxu0 }
 0x137   :  { %v2334_v27 = vld [vmem:[#allocation3] sm:$0xff] }
 0x138   :  { %v2337_v28 = vadd.f32 %v1733_v25, %v2334_v27  ;;  %v2340_v29 = vadd.f32 %v1727_v26, %v2334_v27  ;;  %v370_v30 = vpop.f32.mrf.mxu1  ;;  %v350_v31 = vpop.f32.mrf.mxu0 }
 0x139   :  { %v2343_v32 = vadd.f32 %v2334_v27, %v370_v30  ;;  %v2352_v38 = vadd.f32 %v2334_v27, %v350_v31 }
 0x13a   :  { %v1736_v33 = vpop.f32.mrf.mxu1 }
 0x13b   :  { %v2346_v34 = vadd.f32 %v1736_v33, %v2334_v27  ;;  %v1730_v35 = vpop.f32.mrf.mxu0 }
 0x13c   :  { %v2349_v36 = vadd.f32 %v1730_v35, %v2334_v27  ;;  %v2387_v46 = vpop.f32.mrf.mxu1 }
 0x13d   :  { %v360_v37 = vpop.f32.mrf.mxu0  ;;  %v2453_v3 = vadd.f32 %v2334_v27, %v2387_v46 }
 0x13e   :  { %v2355_v39 = vadd.f32 %v2334_v27, %v360_v37 }
 0x13f   :  { %v472_v40 = vpop.f32.mrf.mxu0 }
 0x140   :  { %v2358_v41 = vadd.f32 %v472_v40, %v2352_v38 }
 0x141   :  { %v1747_v42 = vpop.f32.mrf.mxu0 }
 0x142   :  { %1757 = vmatmul.mubr.msk.f32.vlgmr.msra.gmra.mxu0 %vm160_vm2, %v2358_v41 }
 0x143   :  { %1771 = vmatpush3.msra.mxu0 %v2280_v13  ;;  %1778 = vmatprep.mubr.msk.f32.mxu0 %vm2165_vm0, %v2164_v0 }
 0x144   :  { %1772 = vmatprep.subr.mxu0 %v2164_v0 }
 0x145   :  { %1773 = vmatpush3.msra.mxu0 %v2286_v16 }
 0x146   :  { %1774 = vmatprep.subr.mxu0 %v2164_v0 }
 0x147   :  { %1775 = vmatpush3.msra.mxu0 %v2291_v18 }
 0x148   :  { %1776 = vmatprep.subr.mxu0 %v2164_v0 }
 0x149   :  { %1777 = vmatpush3.msra.mxu0 %v2298_v19 }
 0x14a   :  { %1792 = vmatprep.subr.mxu0 %v2164_v0 }
 0x202   :  { %v546_v43 = vpop.f32.mrf.mxu0 }
 0x203   :  { %v2373_v44 = vadd.f32 %v546_v43, %v2340_v29 }
 0x204   :  { %v1758_v45 = vpop.f32.mrf.mxu0 }
 0x205   :  { %1768 = vmatmul.mubr.msk.f32.vlgmr.msra.gmra.mxu1 %vm160_vm2, %v2373_v44 }
 0x206   :  { %1782 = vmatpush3.msra.mxu1 %v2280_v13  ;;  %1789 = vmatprep.mubr.msk.f32.mxu1 %vm2165_vm0, %v2164_v0 }
 0x207   :  { %1783 = vmatprep.subr.mxu1 %v2164_v0 }
 0x208   :  { %1784 = vmatpush3.msra.mxu1 %v2286_v16 }
 0x209   :  { %1785 = vmatprep.subr.mxu1 %v2164_v0 }
 0x20a   :  { %1786 = vmatpush3.msra.mxu1 %v2291_v18 }
 0x20b   :  { %1787 = vmatprep.subr.mxu1 %v2164_v0 }
 0x20c   :  { %1788 = vmatpush3.msra.mxu1 %v2298_v19 }
 0x20d   :  { %1803 = vmatprep.subr.mxu1 %v2164_v0 }
 0x2c5   :  { %v620_v47 = vpop.f32.mrf.mxu1 }
 0x2c6   :  { %v2390_v48 = vadd.f32 %v620_v47, %v2355_v39 }
 0x2c7   :  { %v1769_v49 = vpop.f32.mrf.mxu1 }
 0x2c8   :  { %1779 = vmatmul.mubr.msk.f32.vlgmr.msra.gmra.mxu0 %vm160_vm2, %v2390_v48 }
 0x2c9   :  { %1793 = vmatpush3.msra.mxu0 %v2280_v13  ;;  %1800 = vmatprep.mubr.msk.f32.mxu0 %vm2165_vm0, %v2164_v0 }
 0x2ca   :  { %1794 = vmatprep.subr.mxu0 %v2164_v0 }
 0x2cb   :  { %1795 = vmatpush3.msra.mxu0 %v2286_v16 }
 0x2cc   :  { %1796 = vmatprep.subr.mxu0 %v2164_v0 }
 0x2cd   :  { %1797 = vmatpush3.msra.mxu0 %v2291_v18 }
 0x2ce   :  { %1798 = vmatprep.subr.mxu0 %v2164_v0 }
 0x2cf   :  { %1799 = vmatpush3.msra.mxu0 %v2298_v19 }
 0x2d0   :  { %1814 = vmatprep.subr.mxu0 %v2164_v0 }
 0x388   :  { %v694_v50 = vpop.f32.mrf.mxu0 }
 0x389   :  { %v2405_v51 = vadd.f32 %v694_v50, %v2349_v36 }
 0x38a   :  { %v1780_v52 = vpop.f32.mrf.mxu0 }
 0x38b   :  { %1790 = vmatmul.mubr.msk.f32.vlgmr.msra.gmra.mxu1 %vm160_vm2, %v2405_v51 }
 0x38c   :  { %1804 = vmatpush3.msra.mxu1 %v2280_v13  ;;  %1811 = vmatprep.mubr.msk.f32.mxu1 %vm2165_vm0, %v2164_v0 }
 0x38d   :  { %1805 = vmatprep.subr.mxu1 %v2164_v0 }
 0x38e   :  { %1806 = vmatpush3.msra.mxu1 %v2286_v16 }
 0x38f   :  { %1807 = vmatprep.subr.mxu1 %v2164_v0 }
 0x390   :  { %1808 = vmatpush3.msra.mxu1 %v2291_v18 }
 0x391   :  { %1809 = vmatprep.subr.mxu1 %v2164_v0 }
 0x392   :  { %1810 = vmatpush3.msra.mxu1 %v2298_v19 }
 0x393   :  { %1825 = vmatprep.subr.mxu1 %v999_v56 }
 0x44b   :  { %v768_v53 = vpop.f32.mrf.mxu1 }
 0x44c   :  { %v2419_v54 = vadd.f32 %v768_v53, %v2343_v32 }
 0x44d   :  { %v1791_v55 = vpop.f32.mrf.mxu1 }
 0x44e   :  { %1801 = vmatmul.mubr.msk.f32.vlgmr.msra.gmra.mxu0 %vm160_vm2, %v2419_v54  ;;  %v1621_v55 = vld [vmem:[%s2606_s10] ss:$0 sm:$0xff]  ;;  %s2168_s10 = smov [#allocation19]  }
 0x44f   :  { %1815 = vmatpush3.msra.mxu0 %v2280_v13  ;;  %1822 = vmatprep.mubr.msk.f32.mxu0 %vm2165_vm0, %v2164_v0  ;;  %v1152_v13 = vld [vmem:[#allocation18 + $0x18] sm:$0xff]  ;;  %s1563_s23 = sshll.u32 %s2168_s10, 4  ;;  %s1564_s23 = int_to_ptr.vmem [resolvable:$true] %s1563_s23 }
 0x450   :  { %1816 = vmatprep.subr.mxu0 %v2164_v0  ;;  %s2121_s24 = scalar_lea.vmem %s1564_s23, 1024  ;;  %p2126_p4 = scmp.lt.s32.totalorder %s1564_s23, %s1564_s23 }
 0x451   :  { %1817 = vmatpush3.msra.mxu0 %v2286_v16  ;;  %v1149_v16 = vld [vmem:[#allocation18] sm:$0xff]  ;;  %p2122_p3 = scmp.ne.s32.totalorder %s1564_s23, %s2121_s24  ;;  %p2127_p5 = scmp.lt.s32.totalorder %s2121_s24, %s2121_s24 }
 0x452   :  { %1818 = vmatprep.subr.mxu0 %v2164_v0 }
 0x453   :  { %1819 = vmatpush3.msra.mxu0 %v2291_v18  ;;  %p2128_p6 = por %p2127_p5, %p2126_p4 }
 0x454   :  { %1820 = vmatprep.subr.mxu0 %v2164_v0  ;;  %v1147_v0 = vld [vmem:[#allocation16 + $0x10] sm:$0xff] }
 0x455   :  { %1821 = vmatpush3.msra.mxu0 %v2298_v19  ;;  %p2129_p7 = pnand %p2128_p6, %p2122_p3 }
 0x456   :  { %1845 = vmatprep.subr.mxu0 %v1152_v13 }
 0x50e   :  { %v842_v57 = vpop.f32.mrf.mxu0 }
 0x50f   :  { %v2433_v58 = vadd.f32 %v842_v57, %v2337_v28 }
 0x510   :  { %v1802_v59 = vpop.f32.mrf.mxu0 }
 0x511   :  { %1812 = vmatmul.mubr.msk.f32.vlgmr.msra.gmra.mxu1 %vm160_vm2, %v2433_v58 }
 0x512   :  { %1826 = vmatpush3.msra.mxu1 %v999_v56  ;;  %1833 = vmatprep.mubr.msk.f32.mxu1 %vm160_vm2, %v2303_v20 }
 0x513   :  { %1827 = vmatprep.subr.mxu1 %v998_v60 }
 0x514   :  { %1828 = vmatpush3.msra.mxu1 %v998_v60 }
 0x515   :  { %1829 = vmatprep.subr.mxu1 %v997_v61 }
 0x516   :  { %1830 = vmatpush3.msra.mxu1 %v997_v61 }
 0x517   :  { %1831 = vmatprep.subr.mxu1 %v996_v62 }
 0x518   :  { %1832 = vmatpush3.msra.mxu1 %v996_v62 }
 0x519   :  { %1834 = vmatmul.mubr.msk.f32.vlgmr.msra.gmra.mxu1 %vm160_vm2, %v2358_v41  ;;  %1865 = vmatprep.subr.mxu1 %v1148_v63 }
 0x51a   :  { %1836 = vmatprep.mubr.msk.f32.mxu1 %vm160_vm2, %v2373_v44  ;;  %1866 = vmatpush3.msra.mxu1 %v1148_v63 }
 0x51b   :  { %1867 = vmatprep.subr.mxu1 %v1147_v0 }
 0x51c   :  { %1868 = vmatpush3.msra.mxu1 %v1147_v0 }
 0x51d   :  { %1837 = vmatmul.mubr.msk.f32.gmra.mxu1 %vm160_vm2, %v2390_v48  ;;  %1869 = vmatprep.subr.mxu1 %v1146_v1 }
 0x51e   :  { %1839 = vmatprep.mubr.msk.f32.mxu1 %vm160_vm2, %v2405_v51  ;;  %1870 = vmatpush3.msra.mxu1 %v1146_v1 }
 0x51f   :  { %1871 = vmatprep.subr.mxu1 %v1145_v2 }
 0x520   :  { %1872 = vmatpush3.msra.mxu1 %v1145_v2 }
 0x521   :  { %1840 = vmatmul.mubr.msk.f32.gmra.mxu1 %vm160_vm2, %v2419_v54 }
 0x522   :  { %1842 = vmatprep.mubr.msk.f32.mxu1 %vm160_vm2, %v2433_v58 }
 0x5d1   :  { %v916_v4 = vpop.f32.mrf.mxu1 }
 0x5d2   :  { %v2456_v5 = vadd.f32 %v916_v4, %v2453_v3 }
 0x5d3   :  { %v1813_v6 = vpop.f32.mrf.mxu1 }
 0x5d4   :  { %1823 = vmatmul.mubr.msk.f32.vlgmr.msra.gmra.mxu0 %vm160_vm2, %v2456_v5  ;;  %1843 = vmatmul.mubr.msk.f32.gmra.mxu1 %vm160_vm2, %v2456_v5 }
 0x5d5   :  { %1873 = vmatprep.mubr.msk.f32.mxu1 %vm160_vm2, %v2358_v41  ;;  %1846 = vmatpush3.msra.mxu0 %v1152_v13 }
 0x5d6   :  { %1847 = vmatprep.subr.mxu0 %v1151_v14 }
 0x5d7   :  { %1848 = vmatpush3.msra.mxu0 %v1151_v14 }
 0x5d8   :  { %1874 = vmatmul.mubr.msk.f32.vlgmr.msra.gmra.mxu1 %vm160_vm2, %v2373_v44  ;;  %1849 = vmatprep.subr.mxu0 %v1150_v15 }
 0x5d9   :  { %v1835_v7 = vpop.f32.mrf.mxu1  ;;  %1876 = vmatprep.mubr.msk.f32.mxu1 %vm160_vm2, %v2390_v48  ;;  %1850 = vmatpush3.msra.mxu0 %v1150_v15 }
 0x5da   :  { %1851 = vmatprep.subr.mxu0 %v1149_v16 }
 0x5db   :  { %v1066_v8 = vpop.f32.mrf.mxu1  ;;  %1852 = vmatpush3.msra.mxu0 %v1149_v16 }
 0x5dc   :  { %1113 = vrot.lane.b32.xlu0 %v1066_v8, %s2166_s7  ;;  %1877 = vmatmul.mubr.msk.f32.gmra.mxu1 %vm160_vm2, %v2405_v51 }
 0x5dd   :  { %v1838_v9 = vpop.f32.mrf.mxu1  ;;  %1879 = vmatprep.mubr.msk.f32.mxu1 %vm160_vm2, %v2419_v54 }
 0x5df   :  { %v1076_v10 = vpop.f32.mrf.mxu1 }
 0x5e0   :  { %1115 = vrot.lane.b32.xlu0 %v1835_v7, %s2166_s7  ;;  %1117 = vrot.lane.b32.xlu1 %v1076_v10, %s2166_s7 }
 0x5e1   :  { %v1841_v11 = vpop.f32.mrf.mxu1  ;;  %1880 = vmatmul.mubr.msk.f32.gmra.mxu1 %vm160_vm2, %v2433_v58 }
 0x5e2   :  { %1882 = vmatprep.mubr.msk.f32.mxu1 %vm160_vm2, %v2456_v5 }
 0x5e3   :  { %v1086_v12 = vpop.f32.mrf.mxu1 }
 0x5e4   :  { %1119 = vrot.lane.b32.xlu1 %v1838_v9, %s2166_s7  ;;  %1121 = vrot.lane.b32.xlu0 %v1086_v12, %s2166_s7 }
 0x5e8   :  { %1123 = vrot.lane.b32.xlu1 %v1841_v11, %s2166_s7 }
 0x64e   :  { %v1114_v17 = vpop.permute.xlu0 %1113 }
 0x64f   :  { %v1137_v27 = vadd.f32 %v1114_v17, %v2352_v38 }
 0x652   :  { %v1118_v18 = vpop.permute.xlu1 %1117  ;;  %v1116_v19 = vpop.permute.xlu0 %1115 }
 0x653   :  { %v1138_v26 = vadd.f32 %v1116_v19, %v2340_v29  ;;  %v1139_v33 = vadd.f32 %v1118_v18, %v2355_v39 }
 0x656   :  { %v1120_v22 = vpop.permute.xlu1 %1119  ;;  %v1122_v29 = vpop.permute.xlu0 %1121 }
 0x657   :  { %v1140_v30 = vadd.f32 %v1120_v22, %v2349_v36  ;;  %v1141_v37 = vadd.f32 %v1122_v29, %v2343_v32 }
 0x65a   :  { %v1124_v31 = vpop.permute.xlu1 %1123 }
 0x65b   :  { %v1142_v35 = vadd.f32 %v1124_v31, %v2337_v28 }
 0x694   :  { %v990_v20 = vpop.f32.mrf.mxu0  ;;  %v1844_v21 = vpop.f32.mrf.mxu1 }
 0x695   :  { %v2483_v23 = vadd.f32 %v990_v20, %v2346_v34  ;;  %1127 = vrot.lane.b32.xlu1 %v1844_v21, %s2166_s7 }
 0x696   :  { %v1824_v24 = vpop.f32.mrf.mxu0  ;;  %v1096_v25 = vpop.f32.mrf.mxu1 }
 0x697   :  { %995 = vst.msk [vmem:[#allocation2] sm:$0xff] %vm160_vm2, %v2483_v23  ;;  %1125 = vrot.lane.b32.xlu0 %v1096_v25, %s2166_s7  ;;  %1883 = vmatmul.mubr.msk.f32.gmra.mxu1 %vm160_vm2, %v2483_v23 }
 0x698   :  { %v1875_v49 = vpop.f32.mrf.mxu1 }
 0x699   :  { %1163 = vrot.lane.b32.xlu1 %v1138_v26, %s2167_s19 }
 0x69a   :  { %v1367_v50 = vpop.f32.mrf.mxu1 }
 0x69b   :  { %1161 = vrot.lane.b32.xlu0 %v1137_v27, %s2167_s19 }
 0x69c   :  { %v1878_v52 = vpop.f32.mrf.mxu1 }
 0x69d   :  { %1167 = vrot.lane.b32.xlu1 %v1140_v30, %s2167_s19 }
 0x69e   :  { %v1377_v57 = vpop.f32.mrf.mxu1 }
 0x69f   :  { %1165 = vrot.lane.b32.xlu0 %v1139_v33, %s2167_s19 }
 0x6a1   :  { %1171 = vrot.lane.b32.xlu1 %v1142_v35, %s2167_s19  ;;  %v1881_v2 = vpop.f32.mrf.mxu1 }
 0x6a3   :  { %1169 = vrot.lane.b32.xlu0 %v1141_v37, %s2167_s19  ;;  %v1387_v9 = vpop.f32.mrf.mxu1 }
 0x707   :  { %v1128_v40 = vpop.permute.xlu1 %1127 }
 0x708   :  { %v1144_v38 = vadd.f32 %v1128_v40, %v2346_v34 }
 0x709   :  { %v1126_v42 = vpop.permute.xlu0 %1125 }
 0x70a   :  { %v1143_v43 = vadd.f32 %v1126_v42, %v2453_v3  ;;  %1175 = vrot.lane.b32.xlu1 %v1144_v38, %s2167_s19 }
 0x70b   :  { %v1164_v36 = vpop.permute.xlu1 %1163 }
 0x70c   :  { %1173 = vrot.lane.b32.xlu0 %v1143_v43, %s2167_s19 }
 0x70d   :  { %v1162_v45 = vpop.permute.xlu0 %1161 }
 0x70e   :  { %1853 = vmatprep.mubr.msk.f32.mxu0 %vm160_vm2, %v1162_v45 }
 0x70f   :  { %1854 = vmatmul.mubr.msk.f32.vlgmr.msra.gmra.mxu0 %vm160_vm2, %v1164_v36  ;;  %v1168_v28 = vpop.permute.xlu1 %1167 }
 0x711   :  { %v1166_v39 = vpop.permute.xlu0 %1165 }
 0x712   :  { %1856 = vmatprep.mubr.msk.f32.mxu0 %vm160_vm2, %v1166_v39 }
 0x713   :  { %1857 = vmatmul.mubr.msk.f32.gmra.mxu0 %vm160_vm2, %v1168_v28  ;;  %v1172_v46 = vpop.permute.xlu1 %1171 }
 0x715   :  { %v1170_v32 = vpop.permute.xlu0 %1169 }
 0x716   :  { %1859 = vmatprep.mubr.msk.f32.mxu0 %vm160_vm2, %v1170_v32 }
 0x717   :  { %1860 = vmatmul.mubr.msk.f32.gmra.mxu0 %vm160_vm2, %v1172_v46 }
 0x757   :  { %v1884_v20 = vpop.f32.mrf.mxu1 }
 0x759   :  { %v1397_v24 = vpop.f32.mrf.mxu1 }
 0x77c   :  { %v1176_v47 = vpop.permute.xlu1 %1175 }
 0x77e   :  { %v1174_v34 = vpop.permute.xlu0 %1173 }
 0x77f   :  { %1862 = vmatprep.mubr.msk.f32.mxu0 %vm160_vm2, %v1174_v34 }
 0x780   :  { %1863 = vmatmul.mubr.msk.f32.gmra.mxu0 %vm160_vm2, %v1176_v47 }
 0x7cf   :  { %v1855_v53 = vpop.f32.mrf.mxu0 }
 0x7d0   :  { %v1373_v56 = vadd.f32 %v1875_v49, %v1855_v53 }
 0x7d1   :  { %v1259_v59 = vpop.f32.mrf.mxu0 }
 0x7d2   :  { %v1368_v60 = vadd.f32 %v1367_v50, %v1259_v59  ;;  %v1414_v61 = vadd.f32 %v1621_v55, %v1373_v56 }
 0x7d3   :  { %v1858_v62 = vpop.f32.mrf.mxu0 }
 0x7d4   :  { %v1383_v63 = vadd.f32 %v1878_v52, %v1858_v62  ;;  %v1424_v0 = vsel %vm160_vm2, %v1414_v61, -inf  ;;  %v1413_v1 = vadd.f32 %v1621_v55, %v1368_v60 }
 0x7d5   :  { %1425 = vmax.xlane.f32.xlu1 %v1424_v0  ;;  %v1269_v3 = vpop.f32.mrf.mxu0 }
 0x7d6   :  { %v1378_v4 = vadd.f32 %v1377_v57, %v1269_v3  ;;  %v1421_v6 = vsel %vm160_vm2, %v1413_v1, -inf  ;;  %v1416_v7 = vadd.f32 %v1621_v55, %v1383_v63 }
 0x7d7   :  { %1422 = vmax.xlane.f32.xlu0 %v1421_v6  ;;  %v1861_v8 = vpop.f32.mrf.mxu0 }
 0x7d8   :  { %v1393_v11 = vadd.f32 %v1881_v2, %v1861_v8  ;;  %v1430_v13 = vsel %vm160_vm2, %v1416_v7, -inf  ;;  %v1415_v14 = vadd.f32 %v1621_v55, %v1378_v4 }
 0x7d9   :  { %v1279_v10 = vpop.f32.mrf.mxu0 }
 0x7da   :  { %v1388_v12 = vadd.f32 %v1387_v9, %v1279_v10  ;;  %v1427_v16 = vsel %vm160_vm2, %v1415_v14, -inf  ;;  %v1418_v18 = vadd.f32 %v1621_v55, %v1393_v11 }
 0x7db   :  { %1431 = vmax.xlane.f32.xlu0 %v1430_v13 }
 0x7dc   :  { %v1417_v15 = vadd.f32 %v1621_v55, %v1388_v12  ;;  %v1436_v19 = vsel %vm160_vm2, %v1418_v18, -inf }
 0x7de   :  { %v1433_v17 = vsel %vm160_vm2, %v1417_v15, -inf }
 0x7df   :  { %1428 = vmax.xlane.f32.xlu0 %v1427_v16  ;;  %1434 = vmax.xlane.f32.xlu1 %v1433_v17 }
 0x7e3   :  { %1437 = vmax.xlane.f32.xlu0 %v1436_v19 }
 0x840   :  { %v1864_v21 = vpop.f32.mrf.mxu0 }
 0x841   :  { %v1403_v22 = vadd.f32 %v1884_v20, %v1864_v21 }
 0x842   :  { %v1289_v25 = vpop.f32.mrf.mxu0 }
 0x843   :  { %v1398_v26 = vadd.f32 %v1397_v24, %v1289_v25  ;;  %v1420_v27 = vadd.f32 %v1621_v55, %v1403_v22 }
 0x845   :  { %v1442_v30 = vsel %vm160_vm2, %v1420_v27, -inf  ;;  %v1419_v31 = vadd.f32 %v1621_v55, %v1398_v26 }
 0x846   :  { %1443 = vmax.xlane.f32.xlu0 %v1442_v30 }
 0x847   :  { %v1439_v33 = vsel %vm160_vm2, %v1419_v31, -inf }
 0x848   :  { %1440 = vmax.xlane.f32.xlu1 %v1439_v33 }
 0x85e   :  { %v1426_v29 = vpop.xlane.xlu1 %1425 }
 0x85f   :  { %v2518_v35 = vsub.f32 %v1414_v61, %v1426_v29 }
 0x860   :  { %v1423_v37 = vpop.xlane.xlu0 %1422 }
 0x861   :  { %v1455_v40 = vmul.f32 1.442695, %v2518_v35  ;;  %v2521_v38 = vsub.f32 %v1413_v1, %v1423_v37 }
 0x863   :  { %1909 = vpow2.f32 %v1455_v40  ;;  %v1453_v42 = vmul.f32 1.442695, %v2521_v38 }
 0x864   :  { %v1432_v43 = vpop.xlane.xlu0 %1431 }
 0x865   :  { %1911 = vpow2.f32 %v1453_v42  ;;  %v2524_v36 = vsub.f32 %v1416_v7, %v1432_v43 }
 0x867   :  { %v1459_v45 = vmul.f32 1.442695, %v2524_v36 }
 0x868   :  { %v1429_v28 = vpop.xlane.xlu0 %1428  ;;  %v1435_v39 = vpop.xlane.xlu1 %1434 }
 0x869   :  { %1913 = vpow2.f32 %v1459_v45  ;;  %v2527_v32 = vsub.f32 %v1415_v14, %v1429_v28  ;;  %v2529_v46 = vsub.f32 %v1417_v15, %v1435_v39 }
 0x86b   :  { %v1457_v34 = vmul.f32 1.442695, %v2527_v32  ;;  %v1461_v47 = vmul.f32 1.442695, %v2529_v46 }
 0x86c   :  { %v1438_v49 = vpop.xlane.xlu0 %1437 }
 0x86d   :  { %1915 = vpow2.f32 %v1457_v34  ;;  %v2533_v50 = vsub.f32 %v1418_v18, %v1438_v49 }
 0x86e   :  { %1917 = vpow2.f32 %v1461_v47 }
 0x86f   :  { %v1463_v52 = vmul.f32 1.442695, %v2533_v50 }
 0x870   :  { %v1910_v53 = vpop.eup %1909 }
 0x871   :  { %1919 = vpow2.f32 %v1463_v52  ;;  %v1472_v55 = vsel %vm160_vm2, %v1910_v53, 0.0 }
 0x872   :  { %v1912_v56 = vpop.eup %1911  ;;  %1473 = vadd.xlane.f32.xlu0 %v1472_v55 }
 0x873   :  { %v1469_v57 = vsel %vm160_vm2, %v1912_v56, 0.0 }
 0x874   :  { %1470 = vadd.xlane.f32.xlu1 %v1469_v57 }
 0x876   :  { %v1914_v59 = vpop.eup %1913 }
 0x877   :  { %v1478_v60 = vsel %vm160_vm2, %v1914_v59, 0.0 }
 0x878   :  { %1479 = vadd.xlane.f32.xlu0 %v1478_v60 }
 0x87a   :  { %v1916_v61 = vpop.eup %1915 }
 0x87b   :  { %v1475_v62 = vsel %vm160_vm2, %v1916_v61, 0.0  ;;  %v1918_v63 = vpop.eup %1917 }
 0x87c   :  { %1476 = vadd.xlane.f32.xlu1 %v1475_v62  ;;  %v1481_v2 = vsel %vm160_vm2, %v1918_v63, 0.0 }
 0x87e   :  { %v1920_v0 = vpop.eup %1919 }
 0x87f   :  { %v1484_v1 = vsel %vm160_vm2, %v1920_v0, 0.0 }
 0x880   :  { %1485 = vadd.xlane.f32.xlu0 %v1484_v1  ;;  %1482 = vadd.xlane.f32.xlu1 %v1481_v2 }
 0x891   :  { %1517 = vrot.lane.b32.xlu1 %v2358_v41, %s2166_s7 }
 0x895   :  { %1521 = vrot.lane.b32.xlu1 %v2390_v48, %s2166_s7 }
 0x896   :  { %1519 = vrot.lane.b32.xlu0 %v2373_v44, %s2166_s7 }
 0x899   :  { %1523 = vrot.lane.b32.xlu1 %v2405_v51, %s2166_s7 }
 0x89a   :  { %1525 = vrot.lane.b32.xlu0 %v2419_v54, %s2166_s7 }
 0x89d   :  { %1527 = vrot.lane.b32.xlu1 %v2433_v58, %s2166_s7 }
 0x8cf   :  { %v1444_v3 = vpop.xlane.xlu0 %1443 }
 0x8d0   :  { %v2554_v4 = vsub.f32 %v1420_v27, %v1444_v3 }
 0x8d1   :  { %v1441_v6 = vpop.xlane.xlu1 %1440 }
 0x8d2   :  { %v1467_v41 = vmul.f32 1.442695, %v2554_v4  ;;  %v2557_v7 = vsub.f32 %v1419_v31, %v1441_v6 }
 0x8d4   :  { %1921 = vpow2.f32 %v1467_v41  ;;  %v1465_v44 = vmul.f32 1.442695, %v2557_v7 }
 0x8d6   :  { %1923 = vpow2.f32 %v1465_v44 }
 0x8e1   :  { %v1922_v48 = vpop.eup %1921 }
 0x8e2   :  { %v1490_v51 = vsel %vm160_vm2, %v1922_v48, 0.0 }
 0x8e3   :  { %v1924_v8 = vpop.eup %1923  ;;  %1491 = vadd.xlane.f32.xlu0 %v1490_v51 }
 0x8e4   :  { %v1487_v54 = vsel %vm160_vm2, %v1924_v8, 0.0 }
 0x8e5   :  { %1488 = vadd.xlane.f32.xlu1 %v1487_v54 }
 0x8f6   :  { %1531 = vrot.lane.b32.xlu1 %v2483_v23, %s2166_s7 }
 0x8f9   :  { %1529 = vrot.lane.b32.xlu0 %v2456_v5, %s2166_s7 }
 0x8fb   :  { %v1474_v58 = vpop.xlane.xlu0 %1473 }
 0x8fc   :  { %1925 = vlog2.f32 %v1474_v58 }
 0x8fd   :  { %v1471_v9 = vpop.xlane.xlu1 %1470 }
 0x8fe   :  { %1927 = vlog2.f32 %v1471_v9 }
 0x901   :  { %v1480_v10 = vpop.xlane.xlu0 %1479 }
 0x902   :  { %1929 = vlog2.f32 %v1480_v10 }
 0x905   :  { %v1477_v11 = vpop.xlane.xlu1 %1476 }
 0x906   :  { %1931 = vlog2.f32 %v1477_v11 }
 0x909   :  { %v1926_v12 = vpop.eup %1925  ;;  %v1486_v13 = vpop.xlane.xlu0 %1485 }
 0x90a   :  { %v1483_v14 = vpop.xlane.xlu1 %1482  ;;  %v1496_v15 = vmul.f32 0.6931472, %v1926_v12  ;;  %1933 = vlog2.f32 %v1486_v13 }
 0x90b   :  { %v1928_v16 = vpop.eup %1927  ;;  %1935 = vlog2.f32 %v1483_v14 }
 0x90c   :  { %v1510_v23 = vsub.f32 %v2518_v35, %v1496_v15  ;;  %v1494_v17 = vmul.f32 0.6931472, %v1928_v16 }
 0x90d   :  { %v1520_v18 = vpop.permute.xlu0 %1519 }
 0x90e   :  { %v1518_v5 = vpop.permute.xlu1 %1517  ;;  %v1509_v19 = vsub.f32 %v2521_v38, %v1494_v17  ;;  %v1542_v20 = vsel %vm160_vm2, %v1510_v23, %v1520_v18 }
 0x90f   :  { %v1930_v21 = vpop.eup %1929  ;;  %1551 = vst.msk [vmem:[#allocation19 + $0x8] sm:$0xff] %vm245_vm3, %v1542_v20 }
 0x910   :  { %v1500_v22 = vmul.f32 0.6931472, %v1930_v21  ;;  %v1541_v24 = vsel %vm160_vm2, %v1509_v19, %v1518_v5 }
 0x911   :  { %1550 = vst.msk [vmem:[#allocation19] sm:$0xff] %vm245_vm3, %v1541_v24  ;;  %v1526_v28 = vpop.permute.xlu0 %1525 }
 0x912   :  { %v1522_v25 = vpop.permute.xlu1 %1521  ;;  %v1512_v27 = vsub.f32 %v2524_v36, %v1500_v22 }
 0x913   :  { %v1932_v26 = vpop.eup %1931 }
 0x914   :  { %v1498_v30 = vmul.f32 0.6931472, %v1932_v26 }
 0x916   :  { %v1524_v31 = vpop.permute.xlu1 %1523  ;;  %v1511_v33 = vsub.f32 %v2527_v32, %v1498_v30 }
 0x917   :  { %v1544_v29 = vsel %vm160_vm2, %v1512_v27, %v1524_v31  ;;  %v1934_v35 = vpop.eup %1933 }
 0x918   :  { %1553 = vst.msk [vmem:[#allocation19 + $0x18] sm:$0xff] %vm245_vm3, %v1544_v29  ;;  %v1936_v37 = vpop.eup %1935  ;;  %v1504_v40 = vmul.f32 0.6931472, %v1934_v35  ;;  %v1543_v38 = vsel %vm160_vm2, %v1511_v33, %v1522_v25 }
 0x919   :  { %v1502_v42 = vmul.f32 0.6931472, %v1936_v37  ;;  %1552 = vst.msk [vmem:[#allocation19 + $0x10] sm:$0xff] %vm245_vm3, %v1543_v38 }
 0x91a   :  { %v1514_v43 = vsub.f32 %v2533_v50, %v1504_v40  ;;  %v1528_v45 = vpop.permute.xlu1 %1527 }
 0x91b   :  { %v1513_v36 = vsub.f32 %v2529_v46, %v1502_v42 }
 0x91c   :  { %v1546_v39 = vsel %vm160_vm2, %v1514_v43, %v1528_v45 }
 0x91d   :  { %v1545_v32 = vsel %vm160_vm2, %v1513_v36, %v1526_v28  ;;  %1555 = vst.msk [vmem:[#allocation19 + $0x28] sm:$0xff] %vm245_vm3, %v1546_v39 }
 0x91e   :  { %1554 = vst.msk [vmem:[#allocation19 + $0x20] sm:$0xff] %vm245_vm3, %v1545_v32 }
 0x96c   :  { %v1492_v34 = vpop.xlane.xlu0 %1491 }
 0x96d   :  { %1937 = vlog2.f32 %v1492_v34 }
 0x96e   :  { %v1489_v47 = vpop.xlane.xlu1 %1488 }
 0x96f   :  { %1939 = vlog2.f32 %v1489_v47 }
 0x970   :  { %v1530_v59 = vpop.permute.xlu0 %1529 }
 0x972   :  { %v1532_v55 = vpop.permute.xlu1 %1531 }
 0x97a   :  { %v1938_v49 = vpop.eup %1937 }
 0x97b   :  { %v1508_v52 = vmul.f32 0.6931472, %v1938_v49 }
 0x97c   :  { %v1940_v53 = vpop.eup %1939 }
 0x97d   :  { %v1516_v50 = vsub.f32 %v2554_v4, %v1508_v52  ;;  %v1506_v46 = vmul.f32 0.6931472, %v1940_v53 }
 0x97f   :  { %v1515_v56 = vsub.f32 %v2557_v7, %v1506_v46  ;;  %v1548_v57 = vsel %vm160_vm2, %v1516_v50, %v1532_v55 }
 0x980   :  { %1557 = vst.msk [vmem:[#allocation19 + $0x38] sm:$0xff] %vm245_vm3, %v1548_v57 }
 0x981   :  { %v1547_v60 = vsel %vm160_vm2, %v1515_v56, %v1530_v59 }
 0x982   :  { %1556 = vst.msk [vmem:[#allocation19 + $0x30] sm:$0xff] %vm245_vm3, %v1547_v60 }
 0x983   :  { %2132 = shalt.err (!%p2129_p7)
}
 0x984   :  { %1569 = dma.vmem_to_hbm [thread:$0]  %s1564_s23, 1024, %s2607_s11, [#allocation6], %s2154_s20, %s2154_s20, %s2155_s21  }
 0x985   :  { %2151 = dma.done.wait [#allocation6], 1024  }
 0x986   :  { %2152 = vsyncadd [#allocation6], 4294966272 }
 0x987   :  { %1573 = vsyncpa [#allocation5], 1 }
 0x988   :  { %1574 = vsyncpa [#allocation8], 1 }
 0x989   :  { %1575 = vsyncpa [#allocation11], 1 }
 0x98a   :  { %1576 = vsyncpa [#allocation14], 1 }
 0x98b   :  { %1577 = vsyncpa [#allocation17], 1 }
 0x98c   :  { %1578 = vsyncpa [#allocation6], 1 }

</bundles_post_ra>
